<compile_context>
chip_gen: v7x
topology: tpu7x:2x2x1
jax: 0.10.0
libtpu: 0.0.40
codegen_flags: <defaults>
</compile_context>

<pallas_src>
import functools

import jax
import jax.numpy as jnp
from jax.experimental import pallas as pl
from jax.experimental.pallas import tpu as pltpu


# ----------------------------------------------------------------------------
# Pallas kernel: one batch element per grid step.
# ----------------------------------------------------------------------------
def mha_kernel(q_ref, k_ref, v_ref, wq_ref, wk_ref, wv_ref, wo_ref, *rest,
               num_heads, causal):
    if len(rest) == 2:
        mask_ref, out_ref = rest            # additive (T, S) mask supplied
    else:
        mask_ref = None
        out_ref = rest[0]

    f32 = jnp.float32
    q = q_ref[0]                            # (T, D) f32
    k = k_ref[0]                            # (S, D) f32
    v = v_ref[0]                            # (S, D) f32
    T, D = q.shape
    S = k.shape[0]
    H = num_heads
    hd = D // H
    cdt = wq_ref.dtype                      # bf16 compute dtype for the MXU

    # --- Q/K/V projections: full K=D, N=D matmuls (scale pre-folded into Wq) ---
    qp = jnp.dot(q.astype(cdt), wq_ref[...], preferred_element_type=f32)  # (T, D)
    kp = jnp.dot(k.astype(cdt), wk_ref[...], preferred_element_type=f32)  # (S, D)
    vp = jnp.dot(v.astype(cdt), wv_ref[...], preferred_element_type=f32)  # (S, D)

    # --- head selector: hsel[h, 0, d] = 1.0 iff column d belongs to head h ---
    d_idx = jax.lax.broadcasted_iota(jnp.int32, (H, 1, D), 2)
    h_idx = jax.lax.broadcasted_iota(jnp.int32, (H, 1, D), 0)
    hsel = jnp.logical_and(d_idx >= h_idx * hd,
                           d_idx < (h_idx + 1) * hd).astype(f32)          # (H, 1, D)

    # per-head Q with other heads' columns zeroed, heads flattened into rows.
    # QK^T for ALL heads is then a single 2-D MXU matmul against the shared K.
    qh = (qp[None, :, :] * hsel).reshape(H * T, D)                        # (H*T, D)
    logits = jax.lax.dot_general(
        qh.astype(cdt), kp.astype(cdt),
        dimension_numbers=(((1,), (1,)), ((), ())),
        preferred_element_type=f32).reshape(H, T, S)                      # (H, T, S)

    if causal:
        t_idx = jax.lax.broadcasted_iota(jnp.int32, (1, T, S), 1)
        s_idx = jax.lax.broadcasted_iota(jnp.int32, (1, T, S), 2)
        logits = logits + jnp.where(s_idx > t_idx, f32(-1e30), f32(0.0))
    if mask_ref is not None:
        logits = logits + mask_ref[...][None, :, :]                       # additive

    # --- softmax in f32; reciprocal routed to the EUP slot ---
    m = jnp.max(logits, axis=-1, keepdims=True)
    p = jnp.exp(logits - m)
    denom = jnp.sum(p, axis=-1, keepdims=True)
    p = p * pl.reciprocal(denom, approx=True)                             # (H, T, S)

    # --- PV for ALL heads as one 2-D MXU matmul against the shared V ---
    o = jax.lax.dot_general(
        p.reshape(H * T, S).astype(cdt), vp.astype(cdt),
        dimension_numbers=(((1,), (0,)), ((), ())),
        preferred_element_type=f32).reshape(H, T, D)                      # (H, T, D)

    # keep only each head's own columns, then collapse heads -> concat layout (T, D)
    o_cat = jnp.sum(o * hsel, axis=0)                                     # (T, D)

    # --- single K=D output projection, single full-width store ---
    out = jnp.dot(o_cat.astype(cdt), wo_ref[...], preferred_element_type=f32)
    out_ref[0] = out.astype(out_ref.dtype)


# ----------------------------------------------------------------------------
# Wrapper
# ----------------------------------------------------------------------------
def mha_pallas(q, k, v, wq, wk, wv, wo, num_heads, attn_mask=None, causal=False,
               compute_dtype=jnp.bfloat16):
    """q: (B,T,D); k,v: (B,S,D); attn_mask: optional (T,S) bool (True == masked)."""
    B, T, D = q.shape
    S = k.shape[1]
    hd = D // num_heads

    # Fold the 1/sqrt(hd) scale into Wq; cast weights to the matmul compute dtype.
    wq_c = (wq * (hd ** -0.5)).astype(compute_dtype)
    wk_c = wk.astype(compute_dtype)
    wv_c = wv.astype(compute_dtype)
    wo_c = wo.astype(compute_dtype)

    q_spec = pl.BlockSpec((1, T, D), lambda b: (b, 0, 0))
    kv_spec = pl.BlockSpec((1, S, D), lambda b: (b, 0, 0))
    w_spec = pl.BlockSpec((D, D), lambda b: (0, 0))

    in_specs = [q_spec, kv_spec, kv_spec, w_spec, w_spec, w_spec, w_spec]
    inputs = [q, k, v, wq_c, wk_c, wv_c, wo_c]
    if attn_mask is not None:
        add_mask = jnp.where(attn_mask, jnp.float32(-1e30), jnp.float32(0.0))
        in_specs.append(pl.BlockSpec((T, S), lambda b: (0, 0)))
        inputs.append(add_mask)

    kern = functools.partial(mha_kernel, num_heads=num_heads, causal=causal)
    return pl.pallas_call(
        kern,
        out_shape=jax.ShapeDtypeStruct((B, T, D), q.dtype),
        grid=(B,),
        in_specs=in_specs,
        out_specs=pl.BlockSpec((1, T, D), lambda b: (b, 0, 0)),
        compiler_params=pltpu.CompilerParams(
            dimension_semantics=("parallel",)),
    )(*inputs)


# ----------------------------------------------------------------------------
# Pure-JAX f32 reference mirroring the PyTorch module exactly.
# ----------------------------------------------------------------------------
def mha_reference(q, k, v, wq, wk, wv, wo, num_heads, attn_mask=None):
    B, T, D = q.shape
    S = k.shape[1]
    hd = D // num_heads
    qp = (q @ wq).reshape(B, T, num_heads, hd).transpose(0, 2, 1, 3)
    kp = (k @ wk).reshape(B, S, num_heads, hd).transpose(0, 2, 1, 3)
    vp = (v @ wv).reshape(B, S, num_heads, hd).transpose(0, 2, 1, 3)
    qp = qp * hd ** (-0.5)
    attn = jnp.einsum('bhtd,bhsd->bhts', qp, kp)
    if attn_mask is not None:
        attn = jnp.where(attn_mask[None, None, :, :], -jnp.inf, attn)
    attn = jax.nn.softmax(attn, axis=-1)
    out = jnp.einsum('bhts,bhsd->bhtd', attn, vp)
    out = out.transpose(0, 2, 1, 3).reshape(B, T, D)
    return out @ wo


# ----------------------------------------------------------------------------
if __name__ == "__main__":
    B, T, S = 2, 8, 16
    d_model, num_heads = 32, 4

    key = jax.random.PRNGKey(0)
    kq, kk, kv, w1, w2, w3, w4 = jax.random.split(key, 7)
    q = jax.random.normal(kq, (B, T, d_model), jnp.float32)
    k = jax.random.normal(kk, (B, S, d_model), jnp.float32)
    v = jax.random.normal(kv, (B, S, d_model), jnp.float32)

    def init_w(wkey, gain=1.0):
        return (gain / jnp.sqrt(d_model)) * jax.random.normal(
            wkey, (d_model, d_model), jnp.float32)

    wq, wk_, wv_ = init_w(w1), init_w(w2), init_w(w3)
    wo = init_w(w4, gain=0.5)

    def check(got, ref, name):
        assert got.shape == ref.shape, name
        assert bool(jnp.all(jnp.isfinite(got))), name
        err = float(jnp.max(jnp.abs(got - ref)))
        assert bool(jnp.allclose(got, ref, atol=5e-2, rtol=5e-2)), (name, err)

    # 1) self-attention with in-kernel causal mask (no mask DMA)
    out_causal = jax.block_until_ready(
        mha_pallas(q, q, q, wq, wk_, wv_, wo, num_heads, causal=True))
    causal_bool = jnp.triu(jnp.ones((T, T), jnp.bool_), k=1)
    ref_causal = mha_reference(q, q, q, wq, wk_, wv_, wo, num_heads, causal_bool)
    check(out_causal, ref_causal, "causal")

    # 2) cross-attention with an explicit boolean attn_mask (padding-style mask)
    pad_bool = jnp.broadcast_to(jnp.arange(S)[None, :] >= S - 4, (T, S))
    out_masked = jax.block_until_ready(
        mha_pallas(q, k, v, wq, wk_, wv_, wo, num_heads, attn_mask=pad_bool))
    ref_masked = mha_reference(q, k, v, wq, wk_, wv_, wo, num_heads, pad_bool)
    check(out_masked, ref_masked, "masked")

    # 3) cross-attention, no mask
    out_plain = jax.block_until_ready(
        mha_pallas(q, k, v, wq, wk_, wv_, wo, num_heads))
    ref_plain = mha_reference(q, k, v, wq, wk_, wv_, wo, num_heads)
    check(out_plain, ref_plain, "plain")

    print("KERNEL_OK")
</pallas_src>

<mosaic_0001>
module attributes {stable_mosaic.version = 11 : i64} {
  func.func @mha_kernel(%arg0: i32, %arg1: memref<1x8x32xf32, #tpu.memory_space<vmem>>, %arg2: memref<1x8x32xf32, #tpu.memory_space<vmem>>, %arg3: memref<1x8x32xf32, #tpu.memory_space<vmem>>, %arg4: memref<32x32xbf16, #tpu.memory_space<vmem>>, %arg5: memref<32x32xbf16, #tpu.memory_space<vmem>>, %arg6: memref<32x32xbf16, #tpu.memory_space<vmem>>, %arg7: memref<32x32xbf16, #tpu.memory_space<vmem>>, %arg8: memref<1x8x32xf32, #tpu.memory_space<vmem>>) attributes {dimension_semantics = [#tpu.dimension_semantics<parallel>], iteration_bounds = array<i64: 2>, scalar_prefetch = 0 : i64, scratch_operands = 0 : i64, tpu.core_type = #tpu.core_type<tc>, window_params = [{transform_indices = @transform_0, window_bounds = array<i64: 1, 8, 32>}, {transform_indices = @transform_1, window_bounds = array<i64: 1, 8, 32>}, {transform_indices = @transform_2, window_bounds = array<i64: 1, 8, 32>}, {pipeline_mode = #tpu.pipeline_mode<synchronous>, transform_indices = @transform_3, window_bounds = array<i64: 32, 32>}, {pipeline_mode = #tpu.pipeline_mode<synchronous>, transform_indices = @transform_4, window_bounds = array<i64: 32, 32>}, {pipeline_mode = #tpu.pipeline_mode<synchronous>, transform_indices = @transform_5, window_bounds = array<i64: 32, 32>}, {pipeline_mode = #tpu.pipeline_mode<synchronous>, transform_indices = @transform_6, window_bounds = array<i64: 32, 32>}, {transform_indices = @transform_7, window_bounds = array<i64: 1, 8, 32>}]} {
    %c0 = arith.constant 0 : index
    %c0_0 = arith.constant 0 : index
    %c0_1 = arith.constant 0 : index
    %0 = vector.load %arg1[%c0, %c0_0, %c0_1] : memref<1x8x32xf32, #tpu.memory_space<vmem>>, vector<1x8x32xf32>
    %1 = vector.shape_cast %0 : vector<1x8x32xf32> to vector<8x32xf32>
    %c0_2 = arith.constant 0 : index
    %c0_3 = arith.constant 0 : index
    %c0_4 = arith.constant 0 : index
    %2 = vector.load %arg2[%c0_2, %c0_3, %c0_4] : memref<1x8x32xf32, #tpu.memory_space<vmem>>, vector<1x8x32xf32>
    %3 = vector.shape_cast %2 : vector<1x8x32xf32> to vector<8x32xf32>
    %c0_5 = arith.constant 0 : index
    %c0_6 = arith.constant 0 : index
    %c0_7 = arith.constant 0 : index
    %4 = vector.load %arg3[%c0_5, %c0_6, %c0_7] : memref<1x8x32xf32, #tpu.memory_space<vmem>>, vector<1x8x32xf32>
    %5 = vector.shape_cast %4 : vector<1x8x32xf32> to vector<8x32xf32>
    %6 = arith.truncf %1 : vector<8x32xf32> to vector<8x32xbf16>
    %c0_8 = arith.constant 0 : index
    %c0_9 = arith.constant 0 : index
    %7 = vector.load %arg4[%c0_8, %c0_9] : memref<32x32xbf16, #tpu.memory_space<vmem>>, vector<32x32xbf16>
    %cst = arith.constant dense<0.000000e+00> : vector<8x32xf32>
    %8 = tpu.matmul %6, %7, %cst {dimension_numbers = #tpu.dot_dimension_numbers<[1], [0], [0], [1], [0, 0, 1, 1], [], []>} : vector<8x32xbf16>, vector<32x32xbf16>, vector<8x32xf32> -> vector<8x32xf32>
    %9 = arith.truncf %3 : vector<8x32xf32> to vector<8x32xbf16>
    %c0_10 = arith.constant 0 : index
    %c0_11 = arith.constant 0 : index
    %10 = vector.load %arg5[%c0_10, %c0_11] : memref<32x32xbf16, #tpu.memory_space<vmem>>, vector<32x32xbf16>
    %cst_12 = arith.constant dense<0.000000e+00> : vector<8x32xf32>
    %11 = tpu.matmul %9, %10, %cst_12 {dimension_numbers = #tpu.dot_dimension_numbers<[1], [0], [0], [1], [0, 0, 1, 1], [], []>} : vector<8x32xbf16>, vector<32x32xbf16>, vector<8x32xf32> -> vector<8x32xf32>
    %12 = arith.truncf %5 : vector<8x32xf32> to vector<8x32xbf16>
    %c0_13 = arith.constant 0 : index
    %c0_14 = arith.constant 0 : index
    %13 = vector.load %arg6[%c0_13, %c0_14] : memref<32x32xbf16, #tpu.memory_space<vmem>>, vector<32x32xbf16>
    %cst_15 = arith.constant dense<0.000000e+00> : vector<8x32xf32>
    %14 = tpu.matmul %12, %13, %cst_15 {dimension_numbers = #tpu.dot_dimension_numbers<[1], [0], [0], [1], [0, 0, 1, 1], [], []>} : vector<8x32xbf16>, vector<32x32xbf16>, vector<8x32xf32> -> vector<8x32xf32>
    %15 = tpu.iota {dimensions = array<i32: 2>} : vector<4x1x32xi32>
    %16 = tpu.iota {dimensions = array<i32: 0>} : vector<4x1x32xi32>
    %c8_i32 = arith.constant 8 : i32
    %17 = vector.broadcast %c8_i32 : i32 to vector<4x1x32xi32>
    %18 = arith.muli %16, %17 : vector<4x1x32xi32>
    %19 = arith.cmpi sge, %15, %18 : vector<4x1x32xi32>
    %c1_i32 = arith.constant 1 : i32
    %20 = vector.broadcast %c1_i32 : i32 to vector<4x1x32xi32>
    %21 = arith.addi %16, %20 : vector<4x1x32xi32>
    %c8_i32_16 = arith.constant 8 : i32
    %22 = vector.broadcast %c8_i32_16 : i32 to vector<4x1x32xi32>
    %23 = arith.muli %21, %22 : vector<4x1x32xi32>
    %24 = arith.cmpi slt, %15, %23 : vector<4x1x32xi32>
    %25 = arith.andi %19, %24 : vector<4x1x32xi1>
    %26 = arith.extui %25 : vector<4x1x32xi1> to vector<4x1x32xi32>
    %27 = arith.sitofp %26 : vector<4x1x32xi32> to vector<4x1x32xf32>
    %28 = vector.shape_cast %8 : vector<8x32xf32> to vector<1x8x32xf32>
    %29 = vector.broadcast %28 : vector<1x8x32xf32> to vector<4x8x32xf32>
    %30 = vector.broadcast %27 : vector<4x1x32xf32> to vector<4x8x32xf32>
    %31 = arith.mulf %29, %30 : vector<4x8x32xf32>
    %32 = vector.shape_cast %31 : vector<4x8x32xf32> to vector<32x32xf32>
    %33 = arith.truncf %32 : vector<32x32xf32> to vector<32x32xbf16>
    %34 = arith.truncf %11 : vector<8x32xf32> to vector<8x32xbf16>
    %cst_17 = arith.constant dense<0.000000e+00> : vector<32x8xf32>
    %35 = tpu.matmul %33, %34, %cst_17 {dimension_numbers = #tpu.dot_dimension_numbers<[1], [1], [0], [0], [0, 0, 1, 0], [], []>} : vector<32x32xbf16>, vector<8x32xbf16>, vector<32x8xf32> -> vector<32x8xf32>
    %36 = vector.shape_cast %35 : vector<32x8xf32> to vector<4x8x8xf32>
    %37 = tpu.iota {dimensions = array<i32: 1>} : vector<1x8x8xi32>
    %38 = tpu.iota {dimensions = array<i32: 2>} : vector<1x8x8xi32>
    %39 = arith.cmpi sgt, %38, %37 : vector<1x8x8xi32>
    %cst_18 = arith.constant -1.000000e+30 : f32
    %cst_19 = arith.constant 0.000000e+00 : f32
    %40 = vector.broadcast %cst_18 : f32 to vector<1x8x8xf32>
    %41 = vector.broadcast %cst_19 : f32 to vector<1x8x8xf32>
    %42 = arith.select %39, %40, %41 : vector<1x8x8xi1>, vector<1x8x8xf32>
    %43 = vector.broadcast %42 : vector<1x8x8xf32> to vector<4x8x8xf32>
    %44 = arith.addf %36, %43 : vector<4x8x8xf32>
    %cst_20 = arith.constant dense<0xFF800000> : vector<4x8xf32>
    %45 = vector.multi_reduction <maximumf>, %44, %cst_20 [2] : vector<4x8x8xf32> to vector<4x8xf32>
    %46 = vector.shape_cast %45 : vector<4x8xf32> to vector<4x8x1xf32>
    %47 = vector.broadcast %46 : vector<4x8x1xf32> to vector<4x8x8xf32>
    %48 = arith.subf %44, %47 : vector<4x8x8xf32>
    %49 = math.exp %48 : vector<4x8x8xf32>
    %cst_21 = arith.constant dense<0.000000e+00> : vector<4x8xf32>
    %50 = vector.multi_reduction <add>, %49, %cst_21 [2] : vector<4x8x8xf32> to vector<4x8xf32>
    %51 = vector.shape_cast %50 : vector<4x8xf32> to vector<4x8x1xf32>
    %52 = tpu.reciprocal %51 {approx = true} : vector<4x8x1xf32> -> vector<4x8x1xf32>
    %53 = vector.broadcast %52 : vector<4x8x1xf32> to vector<4x8x8xf32>
    %54 = arith.mulf %49, %53 : vector<4x8x8xf32>
    %55 = vector.shape_cast %54 : vector<4x8x8xf32> to vector<32x8xf32>
    %56 = arith.truncf %55 : vector<32x8xf32> to vector<32x8xbf16>
    %57 = arith.truncf %14 : vector<8x32xf32> to vector<8x32xbf16>
    %cst_22 = arith.constant dense<0.000000e+00> : vector<32x32xf32>
    %58 = tpu.matmul %56, %57, %cst_22 {dimension_numbers = #tpu.dot_dimension_numbers<[1], [0], [0], [1], [0, 0, 1, 1], [], []>} : vector<32x8xbf16>, vector<8x32xbf16>, vector<32x32xf32> -> vector<32x32xf32>
    %59 = vector.shape_cast %58 : vector<32x32xf32> to vector<4x8x32xf32>
    %60 = vector.broadcast %27 : vector<4x1x32xf32> to vector<4x8x32xf32>
    %61 = arith.mulf %59, %60 : vector<4x8x32xf32>
    %cst_23 = arith.constant dense<0.000000e+00> : vector<8x32xf32>
    %62 = vector.multi_reduction <add>, %61, %cst_23 [0] : vector<4x8x32xf32> to vector<8x32xf32>
    %63 = arith.truncf %62 : vector<8x32xf32> to vector<8x32xbf16>
    %c0_24 = arith.constant 0 : index
    %c0_25 = arith.constant 0 : index
    %64 = vector.load %arg7[%c0_24, %c0_25] : memref<32x32xbf16, #tpu.memory_space<vmem>>, vector<32x32xbf16>
    %cst_26 = arith.constant dense<0.000000e+00> : vector<8x32xf32>
    %65 = tpu.matmul %63, %64, %cst_26 {dimension_numbers = #tpu.dot_dimension_numbers<[1], [0], [0], [1], [0, 0, 1, 1], [], []>} : vector<8x32xbf16>, vector<32x32xbf16>, vector<8x32xf32> -> vector<8x32xf32>
    %c0_27 = arith.constant 0 : index
    %c0_28 = arith.constant 0 : index
    %c0_29 = arith.constant 0 : index
    %66 = vector.load %arg8[%c0_27, %c0_28, %c0_29] : memref<1x8x32xf32, #tpu.memory_space<vmem>>, vector<1x8x32xf32>
    %67 = vector.shape_cast %66 : vector<1x8x32xf32> to vector<8x32xf32>
    %68 = vector.shape_cast %65 : vector<8x32xf32> to vector<1x8x32xf32>
    tpu.vector_store %arg8[%c0_27, %c0_28, %c0_29], %68 {strides = array<i32>} : memref<1x8x32xf32, #tpu.memory_space<vmem>>, vector<1x8x32xf32>,
    return
  }
  func.func @transform_0(%arg0: i32) -> (i32, i32, i32) {
    %c0_i32 = arith.constant 0 : i32
    %c0_i32_0 = arith.constant 0 : i32
    %c0_i32_1 = arith.constant 0 : i32
    return %arg0, %c0_i32, %c0_i32_0 : i32, i32, i32
  }
  func.func @transform_1(%arg0: i32) -> (i32, i32, i32) {
    %c0_i32 = arith.constant 0 : i32
    %c0_i32_0 = arith.constant 0 : i32
    %c0_i32_1 = arith.constant 0 : i32
    return %arg0, %c0_i32, %c0_i32_0 : i32, i32, i32
  }
  func.func @transform_2(%arg0: i32) -> (i32, i32, i32) {
    %c0_i32 = arith.constant 0 : i32
    %c0_i32_0 = arith.constant 0 : i32
    %c0_i32_1 = arith.constant 0 : i32
    return %arg0, %c0_i32, %c0_i32_0 : i32, i32, i32
  }
  func.func @transform_3(%arg0: i32) -> (i32, i32) {
    %c0_i32 = arith.constant 0 : i32
    %c0_i32_0 = arith.constant 0 : i32
    %c0_i32_1 = arith.constant 0 : i32
    return %c0_i32, %c0_i32_0 : i32, i32
  }
  func.func @transform_4(%arg0: i32) -> (i32, i32) {
    %c0_i32 = arith.constant 0 : i32
    %c0_i32_0 = arith.constant 0 : i32
    %c0_i32_1 = arith.constant 0 : i32
    return %c0_i32, %c0_i32_0 : i32, i32
  }
  func.func @transform_5(%arg0: i32) -> (i32, i32) {
    %c0_i32 = arith.constant 0 : i32
    %c0_i32_0 = arith.constant 0 : i32
    %c0_i32_1 = arith.constant 0 : i32
    return %c0_i32, %c0_i32_0 : i32, i32
  }
  func.func @transform_6(%arg0: i32) -> (i32, i32) {
    %c0_i32 = arith.constant 0 : i32
    %c0_i32_0 = arith.constant 0 : i32
    %c0_i32_1 = arith.constant 0 : i32
    return %c0_i32, %c0_i32_0 : i32, i32
  }
  func.func @transform_7(%arg0: i32) -> (i32, i32, i32) {
    %c0_i32 = arith.constant 0 : i32
    %c0_i32_0 = arith.constant 0 : i32
    %c0_i32_1 = arith.constant 0 : i32
    return %arg0, %c0_i32, %c0_i32_0 : i32, i32, i32
  }
}

</mosaic_0001>

<bundles_post_ra>
// kernel: tpu_custom_call.1
= control target key start
LH: loop header
LB: loop body
LE: loop exit
PB: predicated region body
PF: predicated region fallthrough
CT: control target
= control target key end

     0   :  { %s1955_s0 = inlined_call_operand.hbm [shape: f32[2,8,32], index: 0, kind: input, shape index: {}]   ;;  %s1956_s1 = inlined_call_operand.hbm [shape: f32[2,8,32], index: 1, kind: input, shape index: {}]   ;;  %s1957_s2 = inlined_call_operand.hbm [shape: f32[2,8,32], index: 2, kind: input, shape index: {}]   ;;  %s1958_s3 = inlined_call_operand.hbm [shape: bf16[32,32], index: 3, kind: input, shape index: {}]   ;;  %s1959_s4 = inlined_call_operand.hbm [shape: bf16[32,32], index: 4, kind: input, shape index: {}]   ;;  %s1960_s5 = inlined_call_operand.vmem [shape: bf16[32,32], index: 5, kind: input, shape index: {}]   ;;  %s1961_s6 = inlined_call_operand.hbm [shape: bf16[32,32], index: 6, kind: input, shape index: {}]   ;;  %s1962_s7 = inlined_call_operand.hbm [shape: f32[2,8,32], index: 7, kind: output, shape index: {}]  }
   0x1   :  { %1986 = sst [smem:[#allocation24_spill]] %s1956_s1 }
   0x2   :  { %1987 = sst [smem:[#allocation25_spill]] %s1958_s3 }
   0x3   :  { %1988 = sst [smem:[#allocation26_spill]] %s1962_s7 }
   0x4   :  { %12 = vsyncpa [#allocation3], 0 }
   0x5   :  { %14 = vsyncpa [#allocation3 + $0x1], 0 }
   0x6   :  { %15 = vsyncpa [#allocation6], 0 }
   0x7   :  { %17 = vsyncpa [#allocation6 + $0x1], 0 }
   0x8   :  { %18 = vsyncpa [#allocation9], 0 }
   0x9   :  { %19 = vsyncpa [#allocation12], 0 }
   0xa   :  { %20 = vsyncpa [#allocation4], 0 }
   0xb   :  { %22 = vsyncpa [#allocation4 + $0x1], 0  ;;  %s1552_s24 = smov 0   ;;  %s1554_s25 = smov 0  }
   0xc   :  { %s1556_s26 = smov 0   ;;  %s1558_s27 = smov 0  }
   0xd LB: > { %1989 = sst [smem:[#allocation19_spill]] %s1487_s24  ;;  %s1573_s28 = sadd.s32 4294967295, %s1499_s27   ;;  %s1499_s27 = sphi %s1558_s27, %s2026_s27   ;;  %s1495_s26 = sphi %s1556_s26, %s2030_s26   ;;  %s1491_s25 = sphi %s1554_s25, %s2029_s25   ;;  %s1487_s24 = sphi %s1552_s24, %s2028_s24  }
   0xe   : > { %1990 = sst [smem:[#allocation20_spill]] %s1499_s27  ;;  %s1024_s29 = sadd.s32 4294967294, %s1499_s27  }
   0xf   : > { %p48_p0 = scmp.ne.s32.totalorder %s1491_s25, %s1487_s24  ;;  %p1963_p1 = scmp.eq.s32.totalorder %s1573_s28, 0 }
  0x10   : > { %p214_p3 = scmp.eq.s32.totalorder %s1024_s29, 1  ;;  %p1025_p5 = scmp.ge.s32.totalorder %s1499_s27, 1 }
  0x11   : > { %p1582_p4 = por %p1963_p1, %p48_p0  ;;  %p221_p7 = scmp.lt.s32.totalorder %s1499_s27, 3 }
  0x12   : > { %p1587_p6 = por %p214_p3, %p48_p0  ;;  %s1501_s10 = smov [#allocation8]  }
  0x13   : > { %s1991_s30 = scalar_select %p1582_p4, 1, 0 }
  0x14   : > { %s1992_s8 = scalar_select %p1587_p6, 1, 0 }
  0x15   : > { %p1592_p8 = pnand %p1025_p5, %p221_p7  ;;  %s233_s11 = sshll.u32 %s1501_s10, 4  ;;  %s1596_s11 = int_to_ptr.vmem [resolvable:$true] %s233_s11 }
  0x16   : > { %1993 = sst [smem:[#allocation21_spill]] %s1992_s8  ;;  %s1608_s13 = sadd.s32 1, %s1499_s27  }
  0x17   : > { %s1994_s9 = scalar_select %p1592_p8, 1, 0 }
  0x18   : > { %p1152_p9 = pneg %p1592_p8  ;;  %1996 = sst [smem:[#allocation22_spill]] %s1608_s13 }
  0x19   : > { %s35_s14 = sadd.s32 1, %s1495_s26  ;;  %s32_s15 = ssub.s32 %s1499_s27, %s1608_s13 }
  0x1a   : > { %p1603_p11 = pnand %p1152_p9, %p1963_p1  ;;  %s1997_s3 = sld [smem:[#allocation25_spill]] }
  0x1c   : > { %s1995_s12 = scalar_select %p1603_p11, 1, 0 }
  0x1d   : > { %p1621_p13 = pneg %p1603_p11 }
  0x1f   : > { %s1998_s21 = scalar_select %p1621_p13, 1, 0 }
  0x20   : > { %s1247_s18 = scalar_lea.hbm %s1997_s3, 256 }
  0x21   : > { %p1248_p12 = scmp.ne.s32.totalorder %s1997_s3, %s1247_s18  ;;  %p1254_p5 = scmp.lt.u32.totalorder %s1247_s18, %s1997_s3 }
  0x23   : > { %p1250_p0 = pnand %p1621_p13, %p1248_p12 }
  0x25   : > { %p1251_p3 = pneg %p1250_p0 }
  0x27   : > { %p1256_p7 = pnand %p1254_p5, %p1251_p3 }
  0x29   : > { %1259 = shalt.err (!%p1256_p7)
}
  0x2a   : > { %s1260_s29 = scalar_lea.vmem %s1596_s11, 256  ;;  %p1268_p2 = scmp.lt.s32.totalorder %s1596_s11, %s1596_s11 }
  0x2b   : > { %p1261_p9 = scmp.ne.s32.totalorder %s1596_s11, %s1260_s29  ;;  %p1269_p6 = scmp.lt.s32.totalorder %s1260_s29, %s1260_s29 }
  0x2d   : > { %p1263_p10 = pnand %p1261_p9, %p1621_p13  ;;  %p1270_p12 = por %p1269_p6, %p1268_p2 }
  0x2f   : > { %p1264_p1 = pneg %p1263_p10 }
  0x31   : > { %p1271_p0 = pnand %p1270_p12, %p1264_p1 }
  0x33   : > { %1274 = shalt.err (!%p1271_p0)
}
  0x34   : > { %s1964_s10 = smov 64   ;;  %s1966_s16 = smov 4  }
  0x35   : > { %1155 = dma.hbm_to_vmem [thread:$0]  (!%p1603_p11), %s1997_s3, 256, %s1596_s11, [#allocation9], %s1964_s10, %s1964_s10, %s1966_s16  }
  0x36   : > { %p33_p1 = scmp.eq.s32.totalorder %s32_s15, 0  ;;  %p42_p2 = scmp.ne.s32.totalorder %s1495_s26, %s1491_s25 }
  0x37   : > { %p43_p6 = scmp.eq.s32.totalorder %s1499_s27, 0  ;;  %p1179_p10 = scmp.lt.s32.totalorder %s1499_s27, 2 }
  0x38   : > { %s1650_s19 = scalar_select %p33_p1, %s1495_s26, %s35_s14  }
  0x39   : > { %p44_p3 = por %p43_p6, %p42_p2  ;;  %p2000_p5 = scmp.eq.s32.totalorder %s1573_s28, 1 }
  0x3a   : > { %1999 = sst [smem:[#allocation23_spill]] %s1650_s19  ;;  %s1968_s22 = sand.u32 1, %s1495_s26  }
  0x3b   : > { %p1654_p7 = por %p2000_p5, %p42_p2  ;;  %s1660_s23 = sshll.u32 %s1499_s27, 7 }
  0x3c   : > { %s1664_s29 = sshll.u32 %s1968_s22, 3  ;;  %p1666_p9 = pnand %p1179_p10, %p44_p3 }
  0x3d   : > { %s2001_s20 = scalar_select %p1654_p7, 1, 0 }
  0x3e   : > { %s2002_s11 = scalar_select %p1666_p9, 1, 0 }
  0x3f   : > { %s294_s14 = sand.u32 1, %s1499_s27   ;;  %s2003_s1 = sld [smem:[#allocation24_spill]] }
  0x40   : > { %s298_s10 = scalar_lea.vmem [#allocation5], %s1664_s29  ;;  %s1680_s22 = scalar_lea.sflag [#allocation6], %s294_s14 }
  0x41   : > { %s305_s16 = sshll.u32 %s298_s10, 4  ;;  %p1686_p0 = pneg %p1666_p9  ;;  %s1678_s16 = int_to_ptr.vmem [resolvable:$true] %s305_s16 }
  0x43   : > { %s2004_s19 = scalar_select %p1686_p0, 1, 0 }
  0x45   : > { %s1675_s18 = scalar_lea.hbm %s2003_s1, %s1660_s23  ;;  %s1280_s13 = scalar_lea.hbm %s2003_s1, 256 }
  0x46   : > { %s1275_s3 = scalar_lea.hbm %s1675_s18, 128  ;;  %p1281_p6 = scmp.lt.u32.totalorder %s1675_s18, %s2003_s1 }
  0x47   : > { %p1276_p12 = scmp.ne.s32.totalorder %s1675_s18, %s1275_s3  ;;  %p1282_p10 = scmp.lt.u32.totalorder %s1280_s13, %s1275_s3 }
  0x48   : > { %p1284_p5 = scmp.lt.u32.totalorder %s1275_s3, %s1675_s18 }
  0x49   : > { %p1278_p1 = pnand %p1686_p0, %p1276_p12  ;;  %p1283_p3 = por %p1282_p10, %p1281_p6 }
  0x4b   : > { %p1279_p2 = pneg %p1278_p1  ;;  %p1285_p7 = por %p1284_p5, %p1283_p3 }
  0x4d   : > { %p1286_p4 = pnand %p1285_p7, %p1279_p2 }
  0x4f   : > { %1289 = shalt.err (!%p1286_p4)
}
  0x50   : > { %s1290_s14 = scalar_lea.vmem %s1678_s16, 128  ;;  %s1504_s15 = smov [#allocation5]  }
  0x51   : > { %p1291_p12 = scmp.ne.s32.totalorder %s1678_s16, %s1290_s14  ;;  %s1295_s17 = sshll.u32 %s1504_s15, 4  ;;  %s1296_s17 = int_to_ptr.vmem [resolvable:$false] %s1295_s17 }
  0x52   : > { %s1297_s27 = scalar_lea.vmem %s1296_s17, 256  ;;  %p1298_p11 = scmp.lt.s32.totalorder %s1678_s16, %s1296_s17 }
  0x53   : > { %p1293_p1 = pnand %p1291_p12, %p1686_p0  ;;  %p1299_p13 = scmp.lt.s32.totalorder %s1297_s27, %s1290_s14 }
  0x55   : > { %p1294_p8 = pneg %p1293_p1  ;;  %p1300_p6 = por %p1299_p13, %p1298_p11 }
  0x57   : > { %p1301_p10 = pnand %p1300_p6, %p1294_p8 }
  0x59   : > { %1304 = shalt.err (!%p1301_p10)
}
  0x5a   : > { %1168 = dma.hbm_to_vmem [thread:$0]  (!%p1666_p9), %s1675_s18, 128, %s1678_s16, %s1680_s22  }
  0x5b   : > { %s1505_s3 = smov [#allocation10]   ;;  %s1506_s10 = smov [#allocation11]  }
  0x5c   : > { %s246_s13 = sshll.u32 %s1505_s3, 4  ;;  %s262_s1 = sshll.u32 %s1506_s10, 4  ;;  %s247_s13 = int_to_ptr.vmem [resolvable:$true] %s246_s13  ;;  %s263_s1 = int_to_ptr.vmem [resolvable:$true] %s262_s1 }
  0x5d   : > { %s1305_s17 = scalar_lea.hbm %s1959_s4, 256  ;;  %p2005_p8 = scmp.ne.s32.totalorder %s1998_s21, 0 }
  0x5e   : > { %p1306_p4 = scmp.ne.s32.totalorder %s1959_s4, %s1305_s17  ;;  %p1312_p7 = scmp.lt.u32.totalorder %s1305_s17, %s1959_s4 }
  0x60   : > { %p1308_p11 = pnand %p1306_p4, %p2005_p8 }
  0x62   : > { %p1309_p13 = pneg %p1308_p11 }
  0x64   : > { %p1314_p2 = pnand %p1312_p7, %p1309_p13 }
  0x66   : > { %1317 = shalt.err (!%p1314_p2)
}
  0x67   : > { %s1318_s16 = scalar_lea.vmem %s247_s13, 256  ;;  %p1326_p1 = scmp.lt.s32.totalorder %s247_s13, %s247_s13 }
  0x68   : > { %p1319_p3 = scmp.ne.s32.totalorder %s247_s13, %s1318_s16  ;;  %p1327_p6 = scmp.lt.s32.totalorder %s1318_s16, %s1318_s16 }
  0x6a   : > { %p1321_p5 = pnand %p1319_p3, %p2005_p8  ;;  %p1328_p10 = por %p1327_p6, %p1326_p1 }
  0x6c   : > { %p1322_p12 = pneg %p1321_p5 }
  0x6e   : > { %p1329_p9 = pnand %p1328_p10, %p1322_p12 }
  0x70   : > { %1332 = shalt.err (!%p1329_p9)
}
  0x71   : > { %p2006_p4 = scmp.ne.s32.totalorder %s1995_s12, 0  ;;  %s2007_s8 = smov 4  }
  0x72   : > { %s2008_s18 = smov 64   ;;  %s1333_s15 = scalar_lea.hbm %s1961_s6, 256 }
  0x73   : > { %1158 = dma.hbm_to_vmem [thread:$0]  (!%p2006_p4), %s1959_s4, 256, %s247_s13, [#allocation9], %s2008_s18, %s2008_s18, %s2007_s8  }
  0x74   : > { %p1334_p11 = scmp.ne.s32.totalorder %s1961_s6, %s1333_s15  ;;  %p1340_p7 = scmp.lt.u32.totalorder %s1333_s15, %s1961_s6 }
  0x76   : > { %p1336_p9 = pnand %p1334_p11, %p2005_p8 }
  0x78   : > { %p1337_p13 = pneg %p1336_p9 }
  0x7a   : > { %p1342_p2 = pnand %p1340_p7, %p1337_p13 }
  0x7c   : > { %1345 = shalt.err (!%p1342_p2)
}
  0x7d   : > { %s1346_s7 = scalar_lea.vmem %s263_s1, 256  ;;  %p1354_p1 = scmp.lt.s32.totalorder %s263_s1, %s263_s1 }
  0x7e   : > { %p1347_p3 = scmp.ne.s32.totalorder %s263_s1, %s1346_s7  ;;  %p1355_p6 = scmp.lt.s32.totalorder %s1346_s7, %s1346_s7 }
  0x80   : > { %p1349_p5 = pnand %p1347_p3, %p2005_p8  ;;  %p1356_p10 = por %p1355_p6, %p1354_p1 }
  0x82   : > { %p1350_p12 = pneg %p1349_p5 }
  0x84   : > { %p1357_p0 = pnand %p1356_p10, %p1350_p12 }
  0x86   : > { %1360 = shalt.err (!%p1357_p0)
}
  0x87   : > { %1161 = dma.hbm_to_vmem [thread:$0]  (!%p2006_p4), %s1961_s6, 256, %s263_s1, [#allocation12], %s2008_s18, %s2008_s18, %s2007_s8  }
  0x88   : > { %s1756_s10 = scalar_lea.hbm %s1955_s0, %s1660_s23  ;;  %s280_s12 = scalar_lea.vmem [#allocation2], %s1664_s29 }
  0x89   : > { %s287_s15 = sshll.u32 %s280_s12, 4  ;;  %s1765_s27 = scalar_lea.hbm %s1957_s2, %s1660_s23  ;;  %s1759_s15 = int_to_ptr.vmem [resolvable:$true] %s287_s15 }
  0x8a   : > { %s2009_s16 = sand.u32 1, %s1495_s26   ;;  %s1361_s8 = scalar_lea.hbm %s1756_s10, 128 }
  0x8b   : > { %s277_s1 = scalar_lea.sflag [#allocation3], %s2009_s16  ;;  %p1362_p0 = scmp.ne.s32.totalorder %s1756_s10, %s1361_s8 }
  0x8c   : > { %p2010_p8 = scmp.ne.s32.totalorder %s2004_s19, 0  ;;  %s1366_s13 = scalar_lea.hbm %s1955_s0, 256 }
  0x8d   : > { %p1367_p9 = scmp.lt.u32.totalorder %s1756_s10, %s1955_s0  ;;  %p1368_p13 = scmp.lt.u32.totalorder %s1366_s13, %s1361_s8 }
  0x8e   : > { %p1364_p4 = pnand %p1362_p0, %p2010_p8  ;;  %p1370_p2 = scmp.lt.u32.totalorder %s1361_s8, %s1756_s10 }
  0x8f   : > { %p1369_p7 = por %p1368_p13, %p1367_p9 }
  0x90   : > { %p1365_p11 = pneg %p1364_p4 }
  0x91   : > { %p1371_p3 = por %p1370_p2, %p1369_p7 }
  0x93   : > { %p1372_p5 = pnand %p1371_p3, %p1365_p11 }
  0x95   : > { %1375 = shalt.err (!%p1372_p5)
}
  0x96   : > { %s1376_s23 = scalar_lea.vmem %s1759_s15, 128  ;;  %s1507_s3 = smov [#allocation2]  }
  0x97   : > { %p1377_p12 = scmp.ne.s32.totalorder %s1759_s15, %s1376_s23  ;;  %s1381_s12 = sshll.u32 %s1507_s3, 4  ;;  %s1382_s12 = int_to_ptr.vmem [resolvable:$false] %s1381_s12 }
  0x98   : > { %s1383_s17 = scalar_lea.vmem %s1382_s12, 256  ;;  %p1384_p10 = scmp.lt.s32.totalorder %s1759_s15, %s1382_s12 }
  0x99   : > { %p1379_p1 = pnand %p1377_p12, %p2010_p8  ;;  %p1385_p0 = scmp.lt.s32.totalorder %s1383_s17, %s1376_s23 }
  0x9b   : > { %p1380_p6 = pneg %p1379_p1  ;;  %p1386_p4 = por %p1385_p0, %p1384_p10 }
  0x9d   : > { %p1387_p9 = pnand %p1386_p4, %p1380_p6 }
  0x9f   : > { %1390 = shalt.err (!%p1387_p9)
}
  0xa0   : > { %p2011_p11 = scmp.ne.s32.totalorder %s2002_s11, 0  ;;  %s316_s14 = scalar_lea.vmem [#allocation7], %s1664_s29 }
  0xa1   : > { %s323_s16 = sshll.u32 %s316_s14, 4  ;;  %s1391_s8 = scalar_lea.hbm %s1765_s27, 128  ;;  %s324_s16 = int_to_ptr.vmem [resolvable:$true] %s323_s16 }
  0xa2   : > { %1165 = dma.hbm_to_vmem [thread:$0]  (!%p2011_p11), %s1756_s10, 128, %s1759_s15, %s277_s1  }
  0xa3   : > { %p1392_p13 = scmp.ne.s32.totalorder %s1765_s27, %s1391_s8  ;;  %s1396_s13 = scalar_lea.hbm %s1957_s2, 256 }
  0xa4   : > { %p1397_p3 = scmp.lt.u32.totalorder %s1765_s27, %s1957_s2  ;;  %p1398_p5 = scmp.lt.u32.totalorder %s1396_s13, %s1391_s8 }
  0xa5   : > { %p1394_p7 = pnand %p1392_p13, %p2010_p8  ;;  %p1400_p1 = scmp.lt.u32.totalorder %s1391_s8, %s1765_s27 }
  0xa6   : > { %p1399_p12 = por %p1398_p5, %p1397_p3 }
  0xa7   : > { %p1395_p2 = pneg %p1394_p7 }
  0xa8   : > { %p1401_p6 = por %p1400_p1, %p1399_p12 }
  0xaa   : > { %p1402_p10 = pnand %p1401_p6, %p1395_p2 }
  0xac   : > { %1405 = shalt.err (!%p1402_p10)
}
  0xad   : > { %s1406_s29 = scalar_lea.vmem %s324_s16, 128  ;;  %s1508_s10 = smov [#allocation7]  }
  0xae   : > { %p1407_p0 = scmp.ne.s32.totalorder %s324_s16, %s1406_s29  ;;  %s1411_s15 = sshll.u32 %s1508_s10, 4  ;;  %s1412_s15 = int_to_ptr.vmem [resolvable:$false] %s1411_s15 }
  0xaf   : > { %s1413_s1 = scalar_lea.vmem %s1412_s15, 256  ;;  %p1414_p13 = scmp.lt.s32.totalorder %s324_s16, %s1412_s15 }
  0xb0   : > { %p1409_p4 = pnand %p1407_p0, %p2010_p8  ;;  %p1415_p7 = scmp.lt.s32.totalorder %s1413_s1, %s1406_s29 }
  0xb2   : > { %p1410_p9 = pneg %p1409_p4  ;;  %p1416_p11 = por %p1415_p7, %p1414_p13 }
  0xb4   : > { %p1417_p3 = pnand %p1416_p11, %p1410_p9 }
  0xb6   : > { %1420 = shalt.err (!%p1417_p3)
}
  0xb7   : > { %p2012_p5 = scmp.ne.s32.totalorder %s2002_s11, 0  ;;  %p2013_p2 = scmp.ne.s32.totalorder %s1994_s9, 0 }
  0xb8   : > { %s1812_s19 = sand.u32 (!%p2013_p2), 1, %s1491_s25   ;;  %p2014_p8 = scmp.ne.s32.totalorder (!%p2013_p2), %s1991_s30, 0 }
  0xb9   : > { %1171 = dma.hbm_to_vmem [thread:$0]  (!%p2012_p5), %s1765_s27, 128, %s324_s16, %s1680_s22  }
  0xba   : > { %332 = sbr.rel (%p2013_p2) target bundleno = 1427 (0x593), region = 48  ;;  %s1815_s23 = sshll.u32 (!%p2013_p2), %s1812_s19, 3 }
  0xbb   : > { %s335_s3 = scalar_lea.sflag (!%p2013_p2), [#allocation3], %s1812_s19  ;;  %s338_s12 = scalar_lea.vmem (!%p2013_p2), [#allocation2], %s1815_s23 }
  0xc1   : > { %1466 = dma.done.wait (%p2014_p8), %s335_s3, 128  }
  0xc2   : > { %1468 = vsyncadd (%p2014_p8), %s335_s3, 4294967168  ;;  %s343_s9 = sand.u32 1, %s1573_s28   ;;  %s347_s11 = scalar_lea.vmem [#allocation5], %s1815_s23 }
  0xc3   : > { %s344_s22 = scalar_lea.sflag [#allocation6], %s343_s9 }
  0xc4   : > { %1470 = dma.done.wait (%p2014_p8), %s344_s22, 256  }
  0xc5   : > { %1472 = vsyncadd (%p2014_p8), %s344_s22, 4294967040  ;;  %s356_s27 = scalar_lea.vmem [#allocation7], %s1815_s23  ;;  %p2015_p11 = scmp.eq.s32.totalorder %s1573_s28, 0 }
  0xc7   : > { %1474 = dma.done.wait (%p2015_p11), [#allocation9], 512   ;;  %p2016_p12 = pmov %p2015_p11 }
  0xc8   : > { %p2017_p1 = pmov %p2015_p11 }
  0xc9   : > { %1476 = vsyncadd (%p2016_p12), [#allocation9], 4294966784 }
  0xca   : > { %1478 = dma.done.wait (%p2017_p1), [#allocation12], 256   ;;  %p2018_p6 = pmov %p2017_p1 }
  0xcb   : > { %v1509_v0 = vmov 0.0   ;;  %vm1510_vm0 = vmmov 0   ;;  %v1223_v1 = vld [vmem:[#allocation10] sm:$0xff]   ;;  %v1224_v2 = vld [vmem:[#allocation8] sm:$0xff]   ;;  %v1225_v3 = vld [vmem:[#allocation10 + $0x8] sm:$0xff]   ;;  %vm430_vm1 = vcmask 261120   ;;  %v594_v9 = vlaneseq }
  0xcc   : > { %1480 = vsyncadd (%p2018_p6), [#allocation12], 4294967040  ;;  %1094 = vmatprep.subr.bf16.mxu1 %v1509_v0  ;;  %1086 = vmatprep.subr.bf16.mxu0 %v1509_v0  ;;  %v1226_v4 = vld [vmem:[#allocation8 + $0x8] sm:$0xff]   ;;  %v410_v6 = vld [vmem:[%s338_s12] sm:$0xff]  ;;  %vm689_vm13 = vcmask 64512   ;;  %vm743_vm14 = vcmask 1043456  }
  0xcd   : > { %1098 = vmatprep.mubr.msk.bf16.mxu1 %vm1510_vm0, %v1509_v0  ;;  %1090 = vmatprep.mubr.msk.bf16.mxu0 %vm1510_vm0, %v1509_v0  ;;  %v411_v5 = vld [vmem:[%s347_s11] sm:$0xff]  ;;  %v413_v8 = vpack.c.bf16 %v410_v6, %v410_v6  ;;  %v595_v10 = vand.u32 127, %v594_v9  ;;  %v1227_v31 = vld [vmem:[%s1960_s5] sm:$0xff]   ;;  %v1228_v32 = vld [vmem:[%s1960_s5 + $0x8] sm:$0xff]   ;;  %v682_v35 = vshrl.u32 %v594_v9, 7  ;;  %s1065_s8 = sshll.u32 %s1573_s28, 7 }
  0xce   : > { %1095 = vmatpush3.bf16.msra.mxu1 %v1223_v1  ;;  %1087 = vmatpush3.bf16.msra.mxu0 %v1224_v2  ;;  %v474_v7 = vpack.c.bf16 %v411_v5, %v411_v5  ;;  %v412_v33 = vld [vmem:[%s356_s27] sm:$0xff]  ;;  %s408_s18 = scalar_lea.vmem [#allocation13], %s1815_s23  ;;  %s2019_s21 = sld [smem:[#allocation26_spill]] }
  0xcf   : > { %1096 = vmatprep.subr.bf16.mxu1 %v1509_v0  ;;  %1088 = vmatprep.subr.bf16.mxu0 %v1509_v0  ;;  %vm597_vm2 = vcmp.ge.s32.totalorder %v595_v10, 8  ;;  %vm601_vm3 = vcmp.lt.s32.totalorder %v595_v10, 16  ;;  %vm598_vm4 = vcmp.ge.s32.totalorder %v595_v10, 16  ;;  %vm602_vm5 = vcmp.lt.s32.totalorder %v595_v10, 24  ;;  %s882_s7 = sshll.u32 %s408_s18, 4  ;;  %s869_s10 = scalar_lea.sflag [#allocation4], %s1812_s19  ;;  %s1912_s7 = int_to_ptr.vmem [resolvable:$true] %s882_s7 }
  0xd0   : > { %vm599_vm6 = vcmp.ge.s32.totalorder %v595_v10, 24  ;;  %vm603_vm7 = vcmp.lt.s32.totalorder %v595_v10, 32  ;;  %vm605_vm8 = vmand %vm597_vm2, %vm601_vm3  ;;  %vm600_vm9 = vcmp.lt.s32.totalorder %v595_v10, 8  ;;  %v534_v34 = vpack.c.bf16 %v412_v33, %v412_v33  ;;  %s1421_s15 = scalar_lea.vmem %s1912_s7, 128  ;;  %p2020_p0 = scmp.ne.s32.totalorder %s2001_s20, 0 }
  0xd1   : > { %vm606_vm10 = vmand %vm598_vm4, %vm602_vm5  ;;  %v1852_v11 = vsel %vm600_vm9, 1.0, %v1509_v0  ;;  %v1855_v12 = vsel %vm605_vm8, 1.0, %v1509_v0  ;;  %vm683_vm12 = vcmp.gt.s32.totalorder %v595_v10, %v682_v35  ;;  %p1422_p10 = scmp.ne.s32.totalorder %s1912_s7, %s1421_s15  ;;  %s1511_s28 = smov [#allocation13]  }
  0xd2   : > { %1097 = vmatpush3.bf16.msra.mxu1 %v1225_v3  ;;  %1089 = vmatpush3.bf16.msra.mxu0 %v1226_v4  ;;  %vm607_vm11 = vmand %vm599_vm6, %vm603_vm7  ;;  %v1858_v14 = vsel %vm606_vm10, 1.0, %v1509_v0  ;;  %v684_v36 = vsel %vm683_vm12, -1e+30, %v1509_v0  ;;  %s1425_s1 = sshll.u32 %s1511_s28, 4  ;;  %s1426_s1 = int_to_ptr.vmem [resolvable:$false] %s1425_s1 }
  0xd3   : > { %1102 = vmatprep.subr.bf16.mxu0 %v1509_v0  ;;  %v1861_v15 = vsel %vm607_vm11, 1.0, %v1509_v0  ;;  %p1423_p4 = pnand %p1422_p10, %p2020_p0  ;;  %s1427_s23 = scalar_lea.vmem %s1426_s1, 256 }
  0xd4   : > { %s1910_s29 = scalar_lea.hbm %s2019_s21, %s1065_s8  ;;  %p1428_p13 = scmp.lt.s32.totalorder %s1912_s7, %s1426_s1 }
  0xd5   : > { %1099 = vmatmul.mubr.msk.bf16.vlgmr.msra.gmra.mrb[0].mxu1 %vm430_vm1, %v474_v7  ;;  %1091 = vmatmul.mubr.msk.bf16.vlgmr.msra.gmra.mrb[0].mxu0 %vm430_vm1, %v413_v8  ;;  %p1424_p9 = pneg %p1423_p4  ;;  %p1429_p7 = scmp.lt.s32.totalorder %s1427_s23, %s1421_s15 }
  0xd6   : > { %1106 = vmatprep.mubr.msk.bf16.mxu0 %vm1510_vm0, %v1509_v0  ;;  %1103 = vmatpush3.bf16.msra.mxu0 %v1227_v31  ;;  %v1230_v31 = vld [vmem:[#allocation11 + $0x8] sm:$0xff]  }
  0xd7   : > { %1104 = vmatprep.subr.bf16.mxu0 %v1509_v0  ;;  %p1430_p3 = por %p1429_p7, %p1428_p13 }
  0xd9   : > { %p1431_p5 = pnand %p1430_p3, %p1424_p9 }
  0xda   : > { %1105 = vmatpush3.bf16.msra.mxu0 %v1228_v32 }
  0xdd   : > { %1107 = vmatmul.mubr.msk.bf16.vlgmr.msra.gmra.mrb[4].mxu0 %vm430_vm1, %v534_v34 }
 0x1a8   : > { %v528_v13 = vpop.f32.mrb[0].mxu1  ;;  %v468_v18 = vpop.f32.mrb[0].mxu0 }
 0x1a9   : > { %v622_v16 = vpack.c.bf16 %v528_v13, %v528_v13  ;;  %v1100_v17 = vpop.f32.mrb[1].mxu1  ;;  %v616_v20 = vmul.f32 %v1852_v11, %v468_v18  ;;  %v617_v21 = vmul.f32 %v1855_v12, %v468_v18  ;;  %v1092_v22 = vpop.f32.mrb[1].mxu0  ;;  %v618_v24 = vmul.f32 %v1858_v14, %v468_v18 }
 0x1aa   : > { %v531_v19 = vpop.f32.mrb[2].mxu1  ;;  %v619_v25 = vmul.f32 %v1861_v15, %v468_v18  ;;  %v471_v27 = vpop.f32.mrb[2].mxu0 }
 0x1ab   : > { %v630_v23 = vsel %vm430_vm1, %v622_v16, 0  ;;  %v1101_v26 = vpop.f32.mrb[3].mxu1  ;;  %1130 = vmatprep.subr.msk.bf16.mxu1 %vm430_vm1, %v622_v16  ;;  %v1093_v28 = vpop.f32.mrb[3].mxu0  ;;  %v620_v29 = vpack.c.bf16 %v617_v21, %v616_v20 }
 0x1ac   : > { %1111 = vmatpush3.bf16.xpose.msra.mxu1 %v630_v23  ;;  %v621_v30 = vpack.c.bf16 %v619_v25, %v618_v24 }
 0x1ad   : > { %1122 = vmatprep.subr.bf16.mxu1 %v1509_v0  ;;  %1112 = vmatprep.mubr.msk.bf16.mxu1 %vm430_vm1, %v620_v29 }
 0x1b0   : > { %v588_v6 = vpop.f32.mrb[4].mxu0 }
 0x1b1   : > { %v1108_v7 = vpop.f32.mrb[5].mxu0  ;;  %v736_v10 = vpack.c.bf16 %v588_v6, %v588_v6 }
 0x1b2   : > { %v591_v8 = vpop.f32.mrb[6].mxu0 }
 0x1b3   : > { %1113 = vmatmul.mubr.msk.bf16.vlgmr.msra.gmra.mrb[4].mxu1 %vm430_vm1, %v621_v30  ;;  %v1109_v9 = vpop.f32.mrb[7].mxu0  ;;  %v745_v13 = vsel %vm743_vm14, %v736_v10, 0  ;;  %1131 = vmatprep.subr.msk.bf16.mxu0 %vm743_vm14, %v736_v10  ;;  %v1229_v30 = vld [vmem:[#allocation11] sm:$0xff]  }
 0x1b4   : > { %1126 = vmatprep.mubr.msk.bf16.mxu1 %vm1510_vm0, %v1509_v0  ;;  %1117 = vmatpush3.bf16.msra.mxu0 %v745_v13 }
 0x1b5   : > { %1123 = vmatpush3.bf16.msra.mxu1 %v1229_v30 }
 0x1b6   : > { %1124 = vmatprep.subr.bf16.mxu1 %v1509_v0 }
 0x1b9   : > { %1125 = vmatpush3.bf16.msra.mxu1 %v1230_v31 }
 0x286   : > { %v1114_v37 = vpop.f32.mrb[4].mxu1 }
 0x287   : > { %v687_v38 = vadd.f32 %v1114_v37, %v684_v36  ;;  %v666_v39 = vpop.f32.mrb[5].mxu1 }
 0x288   : > { %v685_v40 = vadd.f32 %v684_v36, %v666_v39  ;;  %v1115_v41 = vpop.f32.mrb[6].mxu1 }
 0x289   : > { %v688_v42 = vadd.f32 %v1115_v41, %v684_v36  ;;  %v669_v43 = vpop.f32.mrb[7].mxu1  ;;  %v696_v44 = vsel %vm689_vm13, %v687_v38, -inf }
 0x28a   : > { %v686_v45 = vadd.f32 %v684_v36, %v669_v43  ;;  %697 = vmax.xlane.f32.xlu1 %v696_v44  ;;  %v690_v46 = vsel %vm689_vm13, %v685_v40, -inf }
 0x28b   : > { %691 = vmax.xlane.f32.xlu0 %v690_v46  ;;  %v699_v47 = vsel %vm689_vm13, %v688_v42, -inf }
 0x28c   : > { %v693_v48 = vsel %vm689_vm13, %v686_v45, -inf }
 0x28e   : > { %700 = vmax.xlane.f32.xlu1 %v699_v47 }
 0x28f   : > { %694 = vmax.xlane.f32.xlu0 %v693_v48 }
 0x317   : > { %v698_v49 = vpop.xlane.xlu1 %697 }
 0x318   : > { %v704_v50 = vsub.f32 %v687_v38, %v698_v49  ;;  %v692_v51 = vpop.xlane.xlu0 %691 }
 0x319   : > { %v702_v52 = vsub.f32 %v685_v40, %v692_v51 }
 0x31a   : > { %v710_v53 = vmul.f32 1.442695, %v704_v50 }
 0x31b   : > { %v706_v54 = vmul.f32 1.442695, %v702_v52  ;;  %v701_v55 = vpop.xlane.xlu1 %700 }
 0x31c   : > { %v705_v56 = vsub.f32 %v688_v42, %v701_v55  ;;  %v695_v57 = vpop.xlane.xlu0 %694 }
 0x31d   : > { %1231 = vpow2.f32 %v706_v54  ;;  %v703_v58 = vsub.f32 %v686_v45, %v695_v57 }
 0x31e   : > { %1233 = vpow2.f32 %v710_v53  ;;  %v712_v59 = vmul.f32 1.442695, %v705_v56 }
 0x31f   : > { %v708_v60 = vmul.f32 1.442695, %v703_v58 }
 0x321   : > { %1235 = vpow2.f32 %v708_v60 }
 0x322   : > { %1237 = vpow2.f32 %v712_v59 }
 0x327   : > { %v1232_v61 = vpop.eup %1231 }
 0x328   : > { %v714_v62 = vsel %vm689_vm13, %v1232_v61, 0.0  ;;  %v1234_v63 = vpop.eup %1233 }
 0x329   : > { %715 = vadd.xlane.f32.xlu0 %v714_v62  ;;  %v720_v2 = vsel %vm689_vm13, %v1234_v63, 0.0 }
 0x32b   : > { %v1236_v1 = vpop.eup %1235 }
 0x32c   : > { %v717_v3 = vsel %vm689_vm13, %v1236_v1, 0.0  ;;  %v1238_v4 = vpop.eup %1237 }
 0x32d   : > { %721 = vadd.xlane.f32.xlu0 %v720_v2  ;;  %718 = vadd.xlane.f32.xlu1 %v717_v3  ;;  %v723_v5 = vsel %vm689_vm13, %v1238_v4, 0.0 }
 0x331   : > { %724 = vadd.xlane.f32.xlu1 %v723_v5 }
 0x3b6   : > { %v716_v16 = vpop.xlane.xlu0 %715 }
 0x3b7   : > { %1239 = vrcp.f32 %v716_v16 }
 0x3ba   : > { %v719_v17 = vpop.xlane.xlu1 %718  ;;  %v722_v18 = vpop.xlane.xlu0 %721 }
 0x3bb   : > { %1241 = vrcp.f32 %v719_v17 }
 0x3bc   : > { %1243 = vrcp.f32 %v722_v18 }
 0x3be   : > { %v725_v19 = vpop.xlane.xlu1 %724 }
 0x3bf   : > { %1245 = vrcp.f32 %v725_v19 }
 0x3c1   : > { %v1240_v20 = vpop.eup %1239 }
 0x3c2   : > { %v730_v22 = vmul.f32 %v1240_v20, %v1232_v61 }
 0x3c5   : > { %v1242_v21 = vpop.eup %1241 }
 0x3c6   : > { %v731_v23 = vmul.f32 %v1242_v21, %v1236_v1  ;;  %v1244_v24 = vpop.eup %1243 }
 0x3c7   : > { %v732_v27 = vmul.f32 %v1244_v24, %v1234_v63 }
 0x3c8   : > { %v734_v25 = vpack.c.bf16 %v731_v23, %v730_v22 }
 0x3c9   : > { %v1246_v26 = vpop.eup %1245 }
 0x3ca   : > { %v733_v28 = vmul.f32 %v1246_v26, %v1238_v4  ;;  %1118 = vmatprep.mubr.msk.bf16.mxu0 %vm689_vm13, %v734_v25 }
 0x3cc   : > { %v735_v29 = vpack.c.bf16 %v733_v28, %v732_v27 }
 0x3ce   : > { %1119 = vmatmul.mubr.msk.bf16.vlgmr.msra.gmra.mrb[8].mxu0 %vm689_vm13, %v735_v29 }
 0x4a1   : > { %v1120_v32 = vpop.f32.mrb[8].mxu0 }
 0x4a2   : > { %v781_v33 = vpop.f32.mrb[9].mxu0  ;;  %v798_v37 = vmul.f32 %v1120_v32, %v1858_v14 }
 0x4a3   : > { %v796_v34 = vmul.f32 %v1852_v11, %v781_v33  ;;  %v1121_v35 = vpop.f32.mrb[10].mxu0 }
 0x4a4   : > { %v784_v36 = vpop.f32.mrb[11].mxu0  ;;  %v799_v40 = vmul.f32 %v1121_v35, %v1861_v15  ;;  %v803_v42 = vsel %vm430_vm1, %v798_v37, 0.0 }
 0x4a5   : > { %v797_v38 = vmul.f32 %v1855_v12, %v784_v36  ;;  %v800_v39 = vsel %vm430_vm1, %v796_v34, 0.0 }
 0x4a6   : > { %v805_v11 = vsel %vm430_vm1, %v799_v40, 0.0 }
 0x4a7   : > { %v801_v0 = vsel %vm430_vm1, %v797_v38, 0.0 }
 0x4a8   : > { %v802_v41 = vadd.f32 %v801_v0, %v800_v39 }
 0x4aa   : > { %v804_v43 = vadd.f32 %v803_v42, %v802_v41 }
 0x4ac   : > { %v806_v44 = vadd.f32 %v805_v11, %v804_v43 }
 0x4ae   : > { %v807_v45 = vpack.c.bf16 %v806_v44, %v806_v44 }
 0x4b0   : > { %1127 = vmatmul.mubr.msk.bf16.vlgmr.msra.gmra.mrb[8].mxu1 %vm430_vm1, %v807_v45 }
 0x583   : > { %v861_v12 = vpop.f32.mrb[8].mxu1 }
 0x584   : > { %867 = vst.msk [vmem:[%s408_s18] sm:$0xff] %vm430_vm1, %v861_v12  ;;  %v1128_v14 = vpop.f32.mrb[9].mxu1 }
 0x585   : > { %v864_v15 = vpop.f32.mrb[10].mxu1 }
 0x586   : > { %1434 = shalt.err (!%p1431_p5)
}
 0x587   : > { %s1435_s19 = scalar_lea.hbm %s1910_s29, 128  ;;  %s1439_s9 = scalar_lea.hbm %s2019_s21, 256 }
 0x588   : > { %p1436_p2 = scmp.ne.s32.totalorder %s1910_s29, %s1435_s19  ;;  %p1440_p12 = scmp.lt.u32.totalorder %s1910_s29, %s2019_s21 }
 0x589   : > { %p1441_p1 = scmp.lt.u32.totalorder %s1439_s9, %s1435_s19  ;;  %p1443_p10 = scmp.lt.u32.totalorder %s1435_s19, %s1910_s29 }
 0x58a   : > { %p1437_p8 = pnand %p1436_p2, %p2020_p0 }
 0x58b   : > { %p1442_p6 = por %p1441_p1, %p1440_p12 }
 0x58c   : > { %p1438_p11 = pneg %p1437_p8 }
 0x58d   : > { %p1444_p4 = por %p1443_p10, %p1442_p6 }
 0x58f   : > { %p1445_p9 = pnand %p1444_p4, %p1438_p11 }
 0x591   : > { %1448 = shalt.err (!%p1445_p9)
}
 0x592   : > { %1150 = dma.vmem_to_hbm [thread:$0]  (%p2020_p0), %s1912_s7, 128, %s1910_s29, %s869_s10   ;;  %v1129_v46 = vpop.f32.mrb[11].mxu1 }
 0x593 PF: > { %s2021_s27 = sld [smem:[#allocation19_spill]]  ;;  %s2022_s30 = sld [smem:[#allocation21_spill]] }
 0x594   : > { %s2023_s17 = sld [smem:[#allocation20_spill]] }
 0x599   : > { %s894_s14 = sand.u32 1, %s2021_s27   ;;  %p2024_p13 = scmp.ne.s32.totalorder %s2022_s30, 0 }
 0x59a   : > { %p2025_p7 = scmp.ge.s32.totalorder %s2023_s17, 2  ;;  %s895_s16 = scalar_lea.sflag [#allocation4], %s894_s14 }
 0x59c   : > { %p1173_p3 = pnand %p2025_p7, %p2024_p13 }
 0x59e   : > { %1482 = dma.done.wait (!%p1173_p3), %s895_s16, 128  }
 0x59f   : > { %1484 = vsyncadd (!%p1173_p3), %s895_s16, 4294967168  ;;  %s2026_s27 = sld [smem:[#allocation22_spill]]  ;;  %s2027_s8 = sld [smem:[#allocation23_spill]] }
 0x5a0   : > { %s2028_s24 = smov %s1491_s25  ;;  %s2029_s25 = smov %s1495_s26 }
 0x5a5   : > { %p25_p5 = scmp.ge.s32.totalorder %s2026_s27, 4   ;;  %s2030_s26 = smov %s2027_s8 }
 0x5a7   :  { %27 = sbr.rel (!%p25_p5) target bundleno = 13 (0xd), region = 129 }
 0x5ae   :  { %900 = vsyncpa [#allocation3], 1 }
 0x5af   :  { %902 = vsyncpa [#allocation3 + $0x1], 1 }
 0x5b0   :  { %903 = vsyncpa [#allocation6], 1 }
 0x5b1   :  { %905 = vsyncpa [#allocation6 + $0x1], 1 }
 0x5b2   :  { %906 = vsyncpa [#allocation9], 1 }
 0x5b3   :  { %907 = vsyncpa [#allocation12], 1 }
 0x5b4   :  { %908 = vsyncpa [#allocation4], 1 }
 0x5b5   :  { %910 = vsyncpa [#allocation4 + $0x1], 1 }

</bundles_post_ra>
